<compile_context>
chip_gen: v7x
topology: tpu7x:2x2x1
jax: 0.10.0
libtpu: 0.0.40
codegen_flags: <defaults>
</compile_context>

<pallas_src>
from functools import partial

import jax
import jax.numpy as jnp
from jax.experimental import pallas as pl
from jax.experimental.pallas import tpu as pltpu


def thr_sigmoid_kernel(x_ref, o_ref, *, k, t):
    # Elementwise: 1 / (1 + exp(-k * (x - t))), computed in f32 in-register.
    # exp() runs on the EUP slot and the divide on the VPU; both have huge
    # slack in this memory-bound kernel, so it sits at the HBM roofline.
    z = (x_ref[...].astype(jnp.float32) - t) * k
    o_ref[...] = (1.0 / (1.0 + jnp.exp(-z))).astype(o_ref.dtype)


def _sublane_align(dtype):
    # Minimum sublane multiple per dtype width (f32: 8, bf16: 16, int8/fp8: 32).
    return {4: 8, 2: 16, 1: 32}.get(jnp.dtype(dtype).itemsize, 8)


def thr_sigmoid(x, k, t, *, target_block_bytes=4 << 20):
    """Applies 1 / (1 + exp(-k * (x - t))) elementwise via a Pallas TPU kernel."""
    orig_shape = x.shape
    dtype = x.dtype
    itemsize = jnp.dtype(dtype).itemsize
    n = x.size

    align = _sublane_align(dtype)          # sublane multiple for this dtype
    min_tile = align * 128                 # smallest lane-dense slab

    # Flatten (free bitcast for a contiguous array). Only pad when genuinely
    # ragged; for aligned n there is no extra HBM copy at all.
    flat = x.reshape(-1)
    padded = n % min_tile != 0
    if padded:
        n_padded = pl.cdiv(n, min_tile) * min_tile
        flat = jnp.pad(flat, (0, n_padded - n))
    else:
        n_padded = n

    # Lane width: widest multiple of 128 (<= 1024) that divides n_padded while
    # keeping rows a multiple of the sublane alignment. 128 always works.
    lanes = 128
    for cand in (1024, 512, 256):
        if n_padded % cand == 0 and (n_padded // cand) % align == 0:
            lanes = cand
            break
    rows = n_padded // lanes               # multiple of `align` by construction
    x2d = flat.reshape(rows, lanes)        # free bitcast

    # Block sizing: target ~4 MiB per input block, but keep >= 4 grid steps
    # (>= 2 per TensorCore on v7x) when there is enough work, and never pad
    # the row dimension by more than one sublane group per block.
    max_block_rows = max(align,
                         (target_block_bytes // (lanes * itemsize)) // align * align)
    num_blocks = pl.cdiv(rows, max_block_rows)
    num_blocks = max(num_blocks, min(4, rows // align))
    block_rows = pl.cdiv(pl.cdiv(rows, num_blocks), align) * align
    block_rows = min(block_rows, rows)
    grid_steps = pl.cdiv(rows, block_rows)

    # Advisory cost estimate reflecting actual (block-padded) traffic.
    n_proc = grid_steps * block_rows * lanes
    cost = pl.CostEstimate(
        flops=4 * n_proc,                  # sub, mul, add, div per element
        transcendentals=n_proc,            # one exp per element
        bytes_accessed=2 * n_proc * itemsize,
    )

    kernel = partial(thr_sigmoid_kernel, k=float(k), t=float(t))

    out2d = pl.pallas_call(
        kernel,
        out_shape=jax.ShapeDtypeStruct((rows, lanes), dtype),
        grid=(grid_steps,),
        in_specs=[pl.BlockSpec((block_rows, lanes), lambda i: (i, 0))],
        out_specs=pl.BlockSpec((block_rows, lanes), lambda i: (i, 0)),
        compiler_params=pltpu.CompilerParams(
            dimension_semantics=("parallel",),   # independent blocks -> megacore
            vmem_limit_bytes=48 << 20,           # room for 4 MiB blocks, < 64 MiB v7x
        ),
        cost_estimate=cost,
    )(x2d)

    if padded:
        return out2d.reshape(-1)[:n].reshape(orig_shape)
    return out2d.reshape(orig_shape)       # free bitcast


if __name__ == "__main__":
    k_param, t_param = 10.0, 0.5
    key = jax.random.PRNGKey(0)

    def ref_fn(x):
        xf = x.astype(jnp.float32)
        return (1.0 / (1.0 + jnp.exp(-k_param * (xf - t_param)))).astype(x.dtype)

    # 1) Aligned f32 case (no pad/slice path): (2, 4, 16, 16).
    x1 = jax.random.normal(key, (2, 4, 16, 16), jnp.float32)
    out1 = thr_sigmoid(x1, k_param, t_param)
    jax.block_until_ready(out1)
    assert out1.shape == x1.shape and out1.dtype == x1.dtype
    assert jnp.allclose(out1, ref_fn(x1), atol=1e-6, rtol=1e-6), float(
        jnp.max(jnp.abs(out1 - ref_fn(x1))))

    # 2) Ragged case (pad + slice fallback path): (3, 5, 7).
    x2 = jax.random.normal(jax.random.PRNGKey(1), (3, 5, 7), jnp.float32)
    out2 = thr_sigmoid(x2, k_param, t_param)
    jax.block_until_ready(out2)
    assert out2.shape == x2.shape
    assert jnp.allclose(out2, ref_fn(x2), atol=1e-6, rtol=1e-6)

    # 3) bf16 case (streamed as bf16, upcast in-register only).
    x3 = jax.random.normal(jax.random.PRNGKey(2), (2, 4, 16, 16), jnp.bfloat16)
    out3 = thr_sigmoid(x3, k_param, t_param)
    jax.block_until_ready(out3)
    assert out3.dtype == jnp.bfloat16
    assert jnp.allclose(out3.astype(jnp.float32), ref_fn(x3).astype(jnp.float32),
                        atol=1e-2, rtol=1e-2)

    print("KERNEL_OK")
</pallas_src>

<mosaic_0001>
module attributes {stable_mosaic.version = 11 : i64} {
  func.func @thr_sigmoid_kernel(%arg0: i32, %arg1: memref<8x256xf32, #tpu.memory_space<vmem>>, %arg2: memref<8x256xf32, #tpu.memory_space<vmem>>) attributes {dimension_semantics = [#tpu.dimension_semantics<parallel>], iteration_bounds = array<i64: 1>, scalar_prefetch = 0 : i64, scratch_operands = 0 : i64, tpu.core_type = #tpu.core_type<tc>, window_params = [{transform_indices = @transform_0, window_bounds = array<i64: 8, 256>}, {transform_indices = @transform_1, window_bounds = array<i64: 8, 256>}]} {
    %c0 = arith.constant 0 : index
    %c0_0 = arith.constant 0 : index
    %0 = vector.load %arg1[%c0, %c0_0] : memref<8x256xf32, #tpu.memory_space<vmem>>, vector<8x256xf32>
    %cst = arith.constant 5.000000e-01 : f32
    %1 = vector.broadcast %cst : f32 to vector<8x256xf32>
    %2 = arith.subf %0, %1 : vector<8x256xf32>
    %cst_1 = arith.constant 1.000000e+01 : f32
    %3 = vector.broadcast %cst_1 : f32 to vector<8x256xf32>
    %4 = arith.mulf %2, %3 : vector<8x256xf32>
    %cst_2 = arith.constant 0.000000e+00 : f32
    %5 = vector.broadcast %cst_2 : f32 to vector<8x256xf32>
    %6 = arith.subf %5, %4 : vector<8x256xf32>
    %7 = math.exp %6 : vector<8x256xf32>
    %cst_3 = arith.constant 1.000000e+00 : f32
    %8 = vector.broadcast %cst_3 : f32 to vector<8x256xf32>
    %9 = arith.addf %8, %7 : vector<8x256xf32>
    %cst_4 = arith.constant 1.000000e+00 : f32
    %10 = vector.broadcast %cst_4 : f32 to vector<8x256xf32>
    %11 = arith.divf %10, %9 : vector<8x256xf32>
    %c0_5 = arith.constant 0 : index
    %c0_6 = arith.constant 0 : index
    %12 = vector.load %arg2[%c0_5, %c0_6] : memref<8x256xf32, #tpu.memory_space<vmem>>, vector<8x256xf32>
    tpu.vector_store %arg2[%c0_5, %c0_6], %11 {strides = array<i32>} : memref<8x256xf32, #tpu.memory_space<vmem>>, vector<8x256xf32>,
    return
  }
  func.func @transform_0(%arg0: i32) -> (i32, i32) {
    %c0_i32 = arith.constant 0 : i32
    %c0_i32_0 = arith.constant 0 : i32
    return %arg0, %c0_i32 : i32, i32
  }
  func.func @transform_1(%arg0: i32) -> (i32, i32) {
    %c0_i32 = arith.constant 0 : i32
    %c0_i32_0 = arith.constant 0 : i32
    return %arg0, %c0_i32 : i32, i32
  }
}

</mosaic_0001>

<bundles_post_ra>
// kernel: tpu_custom_call.1
= control target key start
LH: loop header
LB: loop body
LE: loop exit
PB: predicated region body
PF: predicated region fallthrough
CT: control target
= control target key end

     0   :  { %6 = vsyncpa [#allocation3], 0  ;;  %s152_s0 = inlined_call_operand.hbm [shape: f32[8,256], index: 0, kind: input, shape index: {}]   ;;  %s153_s1 = inlined_call_operand.hbm [shape: f32[8,256], index: 1, kind: output, shape index: {}]  }
   0x1   :  { %7 = vsyncpa [#allocation4], 0  ;;  %s116_s6 = smov [#allocation2]   ;;  %s68_s10 = scalar_lea.hbm %s152_s0, 256 }
   0x2   :  { %s14_s7 = sshll.u32 %s116_s6, 4  ;;  %p69_p0 = scmp.ne.s32.totalorder %s152_s0, %s68_s10  ;;  %s15_s7 = int_to_ptr.vmem [resolvable:$true] %s14_s7 }
   0x3   :  { %p72_p1 = scmp.lt.u32.totalorder %s68_s10, %s152_s0 }
   0x5   :  { %p74_p2 = pnand %p72_p1, %p69_p0 }
   0x7   :  { %77 = shalt.err (!%p74_p2)
}
   0x8   :  { %s78_s15 = scalar_lea.vmem %s15_s7, 256  ;;  %p83_p4 = scmp.lt.s32.totalorder %s15_s7, %s15_s7 }
   0x9   :  { %p79_p3 = scmp.ne.s32.totalorder %s15_s7, %s78_s15  ;;  %p84_p5 = scmp.lt.s32.totalorder %s78_s15, %s78_s15 }
   0xb   :  { %p85_p6 = por %p84_p5, %p83_p4 }
   0xd   :  { %p86_p7 = pnand %p85_p6, %p79_p3 }
   0xf   :  { %89 = shalt.err (!%p86_p7)
}
  0x10   :  { %17 = dma.hbm_to_vmem [thread:$0]  %s152_s0, 256, %s15_s7, [#allocation3]  }
  0x11   :  { %112 = dma.done.wait [#allocation3], 256  }
  0x12   :  { %113 = vsyncadd [#allocation3], 4294967040  ;;  %v21_v0 = vld [vmem:[#allocation2] sm:$0xff]  ;;  %v22_v1 = vld [vmem:[#allocation2 + $0x8] sm:$0xff]  ;;  %s117_s0 = smov [#allocation5]  }
  0x13   :  { %v56_v2 = vadd.f32 -0.5, %v21_v0  ;;  %v57_v3 = vadd.f32 -0.5, %v22_v1  ;;  %s47_s18 = sshll.u32 %s117_s0, 4  ;;  %s48_s18 = int_to_ptr.vmem [resolvable:$true] %s47_s18 }
  0x14   :  { %s90_s19 = scalar_lea.vmem %s48_s18, 256  ;;  %p95_p9 = scmp.lt.s32.totalorder %s48_s18, %s48_s18 }
  0x15   :  { %v25_v4 = vmul.f32 10.0, %v56_v2  ;;  %v26_v5 = vmul.f32 10.0, %v57_v3  ;;  %p91_p8 = scmp.ne.s32.totalorder %s48_s18, %s90_s19  ;;  %p96_p10 = scmp.lt.s32.totalorder %s90_s19, %s90_s19 }
  0x17   :  { %v27_v6 = vsub.f32 0.0, %v25_v4  ;;  %v28_v7 = vsub.f32 0.0, %v26_v5  ;;  %p97_p11 = por %p96_p10, %p95_p9 }
  0x19   :  { %v29_v8 = vmul.f32 1.442695, %v27_v6  ;;  %v31_v9 = vmul.f32 1.442695, %v28_v7  ;;  %p98_p12 = pnand %p97_p11, %p91_p8 }
  0x1b   :  { %60 = vpow2.f32 %v29_v8 }
  0x1c   :  { %62 = vpow2.f32 %v31_v9 }
  0x25   :  { %v61_v10 = vpop.eup %60 }
  0x26   :  { %v63_v11 = vpop.eup %62  ;;  %v33_v12 = vadd.f32 1.0, %v61_v10 }
  0x27   :  { %v34_v13 = vadd.f32 1.0, %v63_v11 }
  0x28   :  { %64 = vrcp.f32 %v33_v12 }
  0x29   :  { %66 = vrcp.f32 %v34_v13 }
  0x32   :  { %v65_v14 = vpop.eup %64 }
  0x33   :  { %v67_v15 = vpop.eup %66  ;;  %39 = vst [vmem:[#allocation5] sm:$0xff] %v65_v14 }
  0x34   :  { %40 = vst [vmem:[#allocation5 + $0x8] sm:$0xff] %v67_v15 }
  0x35   :  { %101 = shalt.err (!%p98_p12)
}
  0x36   :  { %s102_s22 = scalar_lea.hbm %s153_s1, 256 }
  0x37   :  { %p103_p13 = scmp.ne.s32.totalorder %s153_s1, %s102_s22  ;;  %p106_p0 = scmp.lt.u32.totalorder %s102_s22, %s153_s1 }
  0x39   :  { %p108_p1 = pnand %p106_p0, %p103_p13 }
  0x3b   :  { %111 = shalt.err (!%p108_p1)
}
  0x3c   :  { %50 = dma.vmem_to_hbm [thread:$0]  %s48_s18, 256, %s153_s1, [#allocation4]  }
  0x3d   :  { %114 = dma.done.wait [#allocation4], 256  }
  0x3e   :  { %115 = vsyncadd [#allocation4], 4294967040 }
  0x3f   :  { %54 = vsyncpa [#allocation3], 1 }
  0x40   :  { %55 = vsyncpa [#allocation4], 1 }

</bundles_post_ra>
